<compile_context>
chip_gen: v7x
topology: tpu7x:2x2x1
jax: 0.10.0
libtpu: 0.0.40
codegen_flags: <defaults>
</compile_context>

<pallas_src>
import functools
import math

import jax
import jax.numpy as jnp
from jax import lax
from jax.experimental import pallas as pl
from jax.experimental.pallas import tpu as pltpu


def _round_up(x, m):
    return (x + m - 1) // m * m


# ---------------------------------------------------------------------------
# Fast path: table resident in VMEM, gather via one-hot MXU matmul.
# ---------------------------------------------------------------------------
def _vmem_onehot_kernel(ids_ref, table_ref, out_ref, *, vocab, scale):
    # ids_ref   : (TB, 1) int32 block
    # table_ref : (V, D)  whole table; constant block index -> stays resident
    # out_ref   : (TB, D) output block
    ids = jnp.clip(ids_ref[...], 0, vocab - 1)                     # (TB, 1)
    tbl = table_ref[...]                                           # (V, D)
    iota = lax.broadcasted_iota(jnp.int32, (ids.shape[0], vocab), 1)
    onehot = (iota == ids).astype(tbl.dtype)                       # (TB, V)
    rows = jnp.dot(onehot, tbl,
                   preferred_element_type=jnp.float32,
                   precision=lax.Precision.HIGHEST)                # (TB, D) f32
    out_ref[...] = (rows * scale).astype(out_ref.dtype)


# ---------------------------------------------------------------------------
# General path: HBM row gather straight into the output block.
# ---------------------------------------------------------------------------
def _hbm_gather_kernel(ids_ref, table_hbm, out_ref, sem, *,
                       token_block, vocab, scale):
    # ids_ref   : (N_pad,) int32 in SMEM (scalar prefetch)
    # table_hbm : (V, D)   embedding table, left in HBM (pl.ANY)
    # out_ref   : (TB, D)  output block in VMEM (also the gather destination)
    # sem       : single shared DMA semaphore
    base = pl.program_id(0) * token_block

    def issue(j, carry):
        tok = jnp.clip(ids_ref[base + j], 0, vocab - 1)
        pltpu.make_async_copy(
            table_hbm.at[pl.ds(tok, 1), :],
            out_ref.at[pl.ds(j, 1), :],
            sem,
        ).start()
        return carry

    # Unrolled issue loop: keep all TB row DMAs in flight.
    lax.fori_loop(0, token_block, issue, 0, unroll=8)

    # One aggregate wait: the DMA semaphore counts bytes and TB copies of
    # (1, D) sum to exactly one (TB, D)-sized transfer.  Using out_ref as the
    # wait descriptor also makes the DMA->load dependency explicit.
    pltpu.make_async_copy(out_ref, out_ref, sem).wait()

    # Scale in place, in the table dtype (bf16 stays bf16, f32 stays f32).
    out_ref[...] = out_ref[...] * scale


# ---------------------------------------------------------------------------
# Wrapper
# ---------------------------------------------------------------------------
def _pick_token_block(n, d, itemsize):
    # ~1 MiB per output buffer -> double-buffered output stays ~2 MiB, well
    # inside every generation's default scoped VMEM (v5e 16 MiB, v7x 32 MiB).
    tb = (1 << 20) // max(1, d * itemsize)
    tb = max(8, min(256, (tb // 8) * 8))
    tb = min(tb, _round_up(n, 8))
    # Give the grid at least 2 steps so both v7x TensorCores get work.
    if n > 8 and _round_up(n, tb) // tb < 2:
        tb = max(8, _round_up((n + 1) // 2, 8))
    return tb


def input_embeddings(x_ids, table, *, force_hbm_gather=False):
    """x_ids: (B, S) int; table: (V, D) -> (B, S, D) = table[x_ids] * sqrt(D)."""
    b, s = x_ids.shape
    v, d = table.shape
    n = b * s
    scale = math.sqrt(d)
    itemsize = jnp.dtype(table.dtype).itemsize

    ids_flat = x_ids.reshape(n).astype(jnp.int32)

    tb = _pick_token_block(n, d, itemsize)
    n_pad = _round_up(n, tb)
    if n_pad != n:
        # Padded rows gather row 0 and are sliced away afterwards.
        ids_flat = jnp.pad(ids_flat, (0, n_pad - n))
    grid = (n_pad // tb,)

    table_bytes = v * d * itemsize
    use_vmem_table = ((not force_hbm_gather)
                      and table_bytes <= (2 << 20) and v <= 2048)

    if use_vmem_table:
        kernel = functools.partial(_vmem_onehot_kernel, vocab=v, scale=scale)
        out_flat = pl.pallas_call(
            kernel,
            out_shape=jax.ShapeDtypeStruct((n_pad, d), table.dtype),
            grid=grid,
            in_specs=[
                pl.BlockSpec((tb, 1), lambda i: (i, 0)),   # ids block
                pl.BlockSpec((v, d), lambda i: (0, 0)),    # whole table, resident
            ],
            out_specs=pl.BlockSpec((tb, d), lambda i: (i, 0)),
            compiler_params=pltpu.CompilerParams(
                dimension_semantics=("parallel",)),
        )(ids_flat.reshape(n_pad, 1), table)
    else:
        kernel = functools.partial(_hbm_gather_kernel, token_block=tb,
                                   vocab=v, scale=scale)
        cost = pl.CostEstimate(
            flops=n_pad * d,                          # the sqrt(D) scaling
            transcendentals=0,
            bytes_accessed=2 * n_pad * d * itemsize + n_pad * 4,
        )
        out_flat = pl.pallas_call(
            kernel,
            out_shape=jax.ShapeDtypeStruct((n_pad, d), table.dtype),
            grid_spec=pltpu.PrefetchScalarGridSpec(
                num_scalar_prefetch=1,                          # ids -> SMEM
                grid=grid,
                in_specs=[pl.BlockSpec(memory_space=pl.ANY)],   # table stays in HBM
                out_specs=pl.BlockSpec((tb, d), lambda i, ids: (i, 0)),
                scratch_shapes=[pltpu.SemaphoreType.DMA(())],   # shared DMA sem
            ),
            compiler_params=pltpu.CompilerParams(
                dimension_semantics=("parallel",)),
            cost_estimate=cost,
        )(ids_flat, table)

    return out_flat[:n].reshape(b, s, d)


if __name__ == "__main__":
    # Small shapes consistent with the module: d_model=128, vocab=64, batch=2, seq=8.
    d_model = 128
    vocab_size = 64
    batch, seq = 2, 8

    key = jax.random.PRNGKey(0)
    k_emb, k_ids = jax.random.split(key)

    # nn.Embedding default init: weight ~ N(0, 1)
    embedding_weight = jax.random.normal(k_emb, (vocab_size, d_model),
                                         dtype=jnp.float32)
    x = jax.random.randint(k_ids, (batch, seq), 0, vocab_size, dtype=jnp.int32)

    ref = embedding_weight[x] * math.sqrt(d_model)

    # 1) VMEM-resident fast path (auto-dispatched for this small vocab).
    out_fast = jax.block_until_ready(input_embeddings(x, embedding_weight))
    assert out_fast.shape == (batch, seq, d_model)
    assert jnp.allclose(out_fast, ref, atol=1e-4, rtol=1e-4), "fast-path mismatch"

    # 2) General HBM row-gather path (forced, so it is exercised too; exact).
    out_gather = jax.block_until_ready(
        input_embeddings(x, embedding_weight, force_hbm_gather=True))
    assert out_gather.shape == (batch, seq, d_model)
    assert jnp.allclose(out_gather, ref, atol=1e-5, rtol=1e-5), "gather-path mismatch"

    print("KERNEL_OK")
</pallas_src>

<mosaic_0001>
module attributes {stable_mosaic.version = 11 : i64} {
  func.func @_vmem_onehot_kernel(%arg0: i32, %arg1: memref<8x1xi32, #tpu.memory_space<vmem>>, %arg2: memref<64x128xf32, #tpu.memory_space<vmem>>, %arg3: memref<8x128xf32, #tpu.memory_space<vmem>>) attributes {dimension_semantics = [#tpu.dimension_semantics<parallel>], iteration_bounds = array<i64: 2>, scalar_prefetch = 0 : i64, scratch_operands = 0 : i64, tpu.core_type = #tpu.core_type<tc>, window_params = [{transform_indices = @transform_0, window_bounds = array<i64: 8, 1>}, {pipeline_mode = #tpu.pipeline_mode<synchronous>, transform_indices = @transform_1, window_bounds = array<i64: 64, 128>}, {transform_indices = @transform_2, window_bounds = array<i64: 8, 128>}]} {
    %c0 = arith.constant 0 : index
    %c0_0 = arith.constant 0 : index
    %0 = vector.load %arg1[%c0, %c0_0] : memref<8x1xi32, #tpu.memory_space<vmem>>, vector<8x1xi32>
    %c0_i32 = arith.constant 0 : i32
    %c63_i32 = arith.constant 63 : i32
    %1 = vector.broadcast %c0_i32 : i32 to vector<8x1xi32>
    %2 = arith.maxsi %1, %0 : vector<8x1xi32>
    %3 = vector.broadcast %c63_i32 : i32 to vector<8x1xi32>
    %4 = arith.minsi %3, %2 : vector<8x1xi32>
    %c0_1 = arith.constant 0 : index
    %c0_2 = arith.constant 0 : index
    %5 = vector.load %arg2[%c0_1, %c0_2] : memref<64x128xf32, #tpu.memory_space<vmem>>, vector<64x128xf32>
    %6 = tpu.iota {dimensions = array<i32: 1>} : vector<8x64xi32>
    %7 = vector.broadcast %4 : vector<8x1xi32> to vector<8x64xi32>
    %8 = arith.cmpi eq, %6, %7 : vector<8x64xi32>
    %9 = arith.extui %8 : vector<8x64xi1> to vector<8x64xi32>
    %10 = arith.sitofp %9 : vector<8x64xi32> to vector<8x64xf32>
    %cst = arith.constant dense<0.000000e+00> : vector<8x128xf32>
    %11 = tpu.matmul %10, %5, %cst {dimension_numbers = #tpu.dot_dimension_numbers<[1], [0], [0], [1], [0, 0, 1, 1], [], []>, precision = #tpu.contract_precision<fp32>} : vector<8x64xf32>, vector<64x128xf32>, vector<8x128xf32> -> vector<8x128xf32>
    %cst_3 = arith.constant 11.3137083 : f32
    %12 = vector.broadcast %cst_3 : f32 to vector<8x128xf32>
    %13 = arith.mulf %11, %12 : vector<8x128xf32>
    %c0_4 = arith.constant 0 : index
    %c0_5 = arith.constant 0 : index
    %14 = vector.load %arg3[%c0_4, %c0_5] : memref<8x128xf32, #tpu.memory_space<vmem>>, vector<8x128xf32>
    tpu.vector_store %arg3[%c0_4, %c0_5], %13 {strides = array<i32>} : memref<8x128xf32, #tpu.memory_space<vmem>>, vector<8x128xf32>,
    return
  }
  func.func @transform_0(%arg0: i32) -> (i32, i32) {
    %c0_i32 = arith.constant 0 : i32
    %c0_i32_0 = arith.constant 0 : i32
    return %arg0, %c0_i32 : i32, i32
  }
  func.func @transform_1(%arg0: i32) -> (i32, i32) {
    %c0_i32 = arith.constant 0 : i32
    %c0_i32_0 = arith.constant 0 : i32
    %c0_i32_1 = arith.constant 0 : i32
    return %c0_i32, %c0_i32_0 : i32, i32
  }
  func.func @transform_2(%arg0: i32) -> (i32, i32) {
    %c0_i32 = arith.constant 0 : i32
    %c0_i32_0 = arith.constant 0 : i32
    return %arg0, %c0_i32 : i32, i32
  }
}

</mosaic_0001>

<bundles_post_ra>
// kernel: tpu_custom_call.1
= control target key start
LH: loop header
LB: loop body
LE: loop exit
PB: predicated region body
PF: predicated region fallthrough
CT: control target
= control target key end

     0   :  { %7 = vsyncpa [#allocation3], 0  ;;  %s1480_s0 = inlined_call_operand.vmem [shape: s32[16,1], index: 0, kind: input, shape index: {}]   ;;  %s1481_s1 = inlined_call_operand.hbm [shape: f32[64,128], index: 1, kind: input, shape index: {}]   ;;  %s1482_s2 = inlined_call_operand.hbm [shape: f32[16,128], index: 2, kind: output, shape index: {}]  }
   0x1   :  { %8 = vsyncpa [#allocation4], 0 }
   0x2   :  { %10 = vsyncpa [#allocation4 + $0x1], 0  ;;  %s1244_s9 = smov 0   ;;  %s1246_s10 = smov 0  }
   0x3   :  { %s1248_s11 = smov 0   ;;  %s1250_s12 = smov 0  }
   0x4 LB: > { %s1265_s13 = sadd.s32 4294967295, %s1219_s12   ;;  %s803_s14 = sadd.s32 4294967294, %s1219_s12   ;;  %s1219_s12 = sphi %s1250_s12, %s1498_s12   ;;  %s1215_s11 = sphi %s1248_s11, %s1497_s11   ;;  %s1211_s10 = sphi %s1246_s10, %s1496_s10   ;;  %s1207_s9 = sphi %s1244_s9, %s1495_s9  }
   0x5   : > { %s1269_s15 = sadd.s32 1, %s1219_s12   ;;  %s70_s16 = sadd.s32 1, %s1215_s11 }
   0x6   : > { %s67_s17 = ssub.s32 %s1219_s12, %s1269_s15  ;;  %p80_p0 = scmp.ne.s32.totalorder %s1215_s11, %s1211_s10 }
   0x7   : > { %p68_p1 = scmp.eq.s32.totalorder %s67_s17, 0  ;;  %p81_p2 = scmp.eq.s32.totalorder %s1265_s13, 1 }
   0x8   : > { %p86_p3 = scmp.ne.s32.totalorder %s1211_s10, %s1207_s9  ;;  %p87_p4 = scmp.eq.s32.totalorder %s803_s14, 1 }
   0x9   : > { %s1280_s18 = scalar_select %p68_p1, %s1215_s11, %s70_s16  }
   0xa   : > { %p1282_p5 = por %p81_p2, %p80_p0  ;;  %p1286_p6 = por %p87_p4, %p86_p3 }
   0xb   : > { %p804_p7 = scmp.ge.s32.totalorder %s1219_s12, 1  ;;  %p94_p8 = scmp.lt.s32.totalorder %s1219_s12, 3 }
   0xc   : > { %s1486_s19 = scalar_select %p1282_p5, 1, 0 }
   0xd   : > { %s1487_s20 = scalar_select %p1286_p6, 1, 0 }
   0xe   : > { %p1483_p9 = scmp.eq.s32.totalorder %s1265_s13, 0  ;;  %p1293_p10 = pnand %p804_p7, %p94_p8 }
   0xf   : > { %s1221_s22 = smov [#allocation2]   ;;  %s1125_s27 = scalar_lea.hbm %s1481_s1, 1024 }
  0x10   : > { %s1488_s21 = scalar_select %p1293_p10, 1, 0 }
  0x11   : > { %s106_s23 = sshll.u32 %s1221_s22, 4  ;;  %p1074_p11 = pneg %p1293_p10  ;;  %s107_s23 = int_to_ptr.vmem [resolvable:$true] %s106_s23 }
  0x12   : > { %p1126_p13 = scmp.ne.s32.totalorder %s1481_s1, %s1125_s27  ;;  %p1132_p3 = scmp.lt.u32.totalorder %s1125_s27, %s1481_s1 }
  0x13   : > { %p1301_p12 = pnand %p1483_p9, %p1074_p11 }
  0x15   : > { %p1127_p0 = pneg %p1301_p12 }
  0x17   : > { %p1128_p1 = pnand %p1127_p0, %p1126_p13 }
  0x19   : > { %p1129_p2 = pneg %p1128_p1 }
  0x1b   : > { %p1134_p4 = pnand %p1132_p3, %p1129_p2 }
  0x1d   : > { %1137 = shalt.err (!%p1134_p4)
}
  0x1e   : > { %s1138_s4 = scalar_lea.vmem %s107_s23, 1024  ;;  %p1146_p9 = scmp.lt.s32.totalorder %s107_s23, %s107_s23 }
  0x1f   : > { %p1139_p7 = scmp.ne.s32.totalorder %s107_s23, %s1138_s4  ;;  %p1147_p6 = scmp.lt.s32.totalorder %s1138_s4, %s1138_s4 }
  0x21   : > { %p1141_p8 = pnand %p1139_p7, %p1127_p0  ;;  %p1148_p5 = por %p1147_p6, %p1146_p9 }
  0x23   : > { %p1142_p11 = pneg %p1141_p8 }
  0x25   : > { %p1149_p10 = pnand %p1148_p5, %p1142_p11 }
  0x27   : > { %1152 = shalt.err (!%p1149_p10)
}
  0x28   : > { %s1222_s5 = smov 128   ;;  %s1223_s6 = smov 8  }
  0x29   : > { %1077 = dma.hbm_to_vmem [thread:$0]  (!%p1301_p12), %s1481_s1, 1024, %s107_s23, [#allocation3], %s1222_s5, %s1222_s5, %s1223_s6  }
  0x2a   : > { %p1490_p13 = scmp.ne.s32.totalorder %s1488_s21, 0 }
  0x2b   : > { %p1491_p1 = scmp.eq.s32.totalorder (!%p1490_p13), %s1265_s13, 0 }
  0x2c   : > { %129 = sbr.rel (%p1490_p13) target bundleno = 464 (0x1d0), region = 28 }
  0x33   : > { %1198 = dma.done.wait (%p1491_p1), [#allocation3], 1024   ;;  %p1492_p0 = pmov %p1491_p1 }
  0x34   : > { %p150_p5 = scmp.lt.s32.totalorder %s1265_s13, 1  ;;  %v1224_v0 = vmov 0   ;;  %v1225_v1 = vmov 0.0|0.0   ;;  %v159_v3 = vld [vmem:[#allocation2] sm:$0xff]  ;;  %v160_v4 = vld [vmem:[#allocation2 + $0x8] sm:$0xff]  ;;  %v161_v7 = vld [vmem:[#allocation2 + $0x10] sm:$0xff] }
  0x35   : > { %1200 = vsyncadd (%p1492_p0), [#allocation3], 4294966272  ;;  %1124 = vset.pattern.permute.xlu0 %v1224_v0  ;;  %1023 = vmatprep.subr.bf16.mxu0 %v1225_v1  ;;  %v180_v5 = vand.u32 4294901760, %v159_v3  ;;  %v183_v6 = vand.u32 4294901760, %v160_v4  ;;  %v162_v8 = vld [vmem:[#allocation2 + $0x18] sm:$0xff]  ;;  %v163_v9 = vld [vmem:[#allocation2 + $0x20] sm:$0xff] }
  0x36   : > { %s151_s14 = scalar_select %p150_p5, %s1265_s13, 1  ;;  %987 = vmatprep.subr.bf16.mxu1 %v1225_v1  ;;  %v186_v11 = vand.u32 4294901760, %v161_v7  ;;  %v189_v12 = vand.u32 4294901760, %v162_v8  ;;  %v164_v13 = vld [vmem:[#allocation2 + $0x28] sm:$0xff]  ;;  %v192_v14 = vand.u32 4294901760, %v163_v9  ;;  %v165_v18 = vld [vmem:[#allocation2 + $0x30] sm:$0xff] }
  0x37   : > { %v1334_v15 = vpack.c.bf16 %v183_v6, %v180_v5  ;;  %v1336_v16 = vsub.f32 %v159_v3, %v180_v5  ;;  %v1338_v17 = vsub.f32 %v160_v4, %v183_v6  ;;  %v166_v19 = vld [vmem:[#allocation2 + $0x38] sm:$0xff]  ;;  %v195_v24 = vand.u32 4294901760, %v164_v13  ;;  %s147_s23 = sand.u32 1, %s1211_s10   ;;  %s816_s25 = sshll.u32 %s1265_s13, 7 }
  0x38   : > { %s810_s16 = sshll.u32 %s151_s14, 3  ;;  %v1340_v21 = vsub.f32 %v161_v7, %v186_v11  ;;  %v1342_v22 = vsub.f32 %v162_v8, %v189_v12  ;;  %v1345_v23 = vpack.c.bf16 %v189_v12, %v186_v11  ;;  %v1347_v25 = vsub.f32 %v163_v9, %v192_v14  ;;  %s809_s24 = sshll.u32 %s147_s23, 3 }
  0x39   : > { %s153_s22 = scalar_lea.vmem %s1480_s0, %s810_s16  ;;  %1025 = vmatpush3.bf16.msra.mxu0 %v1334_v15  ;;  %989 = vmatpush3.bf16.msra.mxu1 %v1334_v15  ;;  %v198_v26 = vand.u32 4294901760, %v165_v18  ;;  %v201_v27 = vand.u32 4294901760, %v166_v19  ;;  %v1352_v28 = vsub.f32 %v164_v13, %v195_v24  ;;  %v265_v31 = vand.u32 4294901760, %v1336_v16  ;;  %s149_s26 = scalar_lea.vmem [#allocation5], %s809_s24 }
  0x3a   : > { %v154_v2 = vld [vmem:[%s153_s22] sm:$0xff]  ;;  %1026 = vmatprep.subr.bf16.mxu0 %v1225_v1  ;;  %990 = vmatprep.subr.bf16.mxu1 %v1225_v1  ;;  %v1360_v32 = vpack.c.bf16 %v195_v24, %v192_v14  ;;  %vm1226_vm2 = vmmov 0   ;;  %v1227_v33 = vmov 0.0   ;;  %v272_v34 = vand.u32 4294901760, %v1338_v17  ;;  %s732_s27 = sshll.u32 %s149_s26, 4  ;;  %s1438_s30 = scalar_lea.hbm %s1482_s2, %s816_s25  ;;  %s1440_s27 = int_to_ptr.vmem [resolvable:$true] %s732_s27 }
  0x3b   : > { %vm155_vm0 = vcmp.gt.s32.totalorder %v154_v2, 0  ;;  %v1354_v29 = vsub.f32 %v165_v18, %v198_v26  ;;  %v1356_v30 = vsub.f32 %v166_v19, %v201_v27  ;;  %946 = vmatprep.mubr.msk.f32.mxu0 %vm1226_vm2, %v1227_v33  ;;  %889 = vmatprep.mubr.msk.f32.mxu1 %vm1226_vm2, %v1227_v33  ;;  %v266_v36 = vsub.f32 %v1336_v16, %v265_v31  ;;  %s719_s3 = scalar_lea.sflag [#allocation4], %s147_s23  ;;  %s1153_s4 = scalar_lea.vmem %s1440_s27, 128 }
  0x3c   : > { %v156_v10 = vsel %vm155_vm0, %v154_v2, 0  ;;  %v1036_v35 = vpack.c.bf16 %v272_v34, %v265_v31  ;;  %v273_v37 = vsub.f32 %v1338_v17, %v272_v34  ;;  %v1372_v38 = vpack.c.bf16 %v201_v27, %v198_v26  ;;  %p1154_p6 = scmp.ne.s32.totalorder %s1440_s27, %s1153_s4  ;;  %p1493_p9 = scmp.ne.s32.totalorder %s1486_s19, 0 }
  0x3d   : > { %vm157_vm1 = vcmp.lt.s32.totalorder %v156_v10, 63  ;;  %1028 = vmatpush3.bf16.msra.mxu0 %v1345_v23  ;;  %992 = vmatpush3.bf16.msra.mxu1 %v1345_v23  ;;  %v267_v39 = vand.u32 4294901760, %v266_v36  ;;  %v279_v41 = vand.u32 4294901760, %v1340_v21  ;;  %v286_v42 = vand.u32 4294901760, %v1342_v22  ;;  %s1228_s13 = smov [#allocation5]  }
  0x3e   : > { %v158_v20 = vsel %vm157_vm1, %v156_v10, 63  ;;  %1029 = vmatprep.subr.bf16.mxu0 %v1225_v1  ;;  %993 = vmatprep.subr.bf16.mxu1 %v1225_v1  ;;  %v274_v40 = vand.u32 4294901760, %v273_v37  ;;  %v293_v49 = vand.u32 4294901760, %v1347_v25  ;;  %v300_v50 = vand.u32 4294901760, %v1352_v28  ;;  %p1155_p10 = pnand %p1154_p6, %p1493_p9  ;;  %s1157_s5 = sshll.u32 %s1228_s13, 4  ;;  %s1158_s5 = int_to_ptr.vmem [resolvable:$false] %s1157_s5 }
  0x3f   : > { %170 = vperm.xlu0 %1124, %v158_v20   ;;  %v1039_v44 = vpack.c.bf16 %v286_v42, %v279_v41  ;;  %v280_v45 = vsub.f32 %v1340_v21, %v279_v41  ;;  %v287_v46 = vsub.f32 %v1342_v22, %v286_v42  ;;  %v307_v57 = vand.u32 4294901760, %v1354_v29  ;;  %s1159_s6 = scalar_lea.vmem %s1158_s5, 256  ;;  %p1160_p2 = scmp.lt.s32.totalorder %s1440_s27, %s1158_s5 }
  0x40   : > { %v1000_v43 = vpack.c.bf16 %v274_v40, %v267_v39  ;;  %v1042_v52 = vpack.c.bf16 %v300_v50, %v293_v49  ;;  %v294_v53 = vsub.f32 %v1347_v25, %v293_v49  ;;  %v301_v54 = vsub.f32 %v1352_v28, %v300_v50  ;;  %p1156_p12 = pneg %p1155_p10  ;;  %p1161_p3 = scmp.lt.s32.totalorder %s1159_s6, %s1153_s4 }
  0x41   : > { %1031 = vmatpush3.bf16.msra.mxu0 %v1360_v32  ;;  %995 = vmatpush3.bf16.msra.mxu1 %v1360_v32  ;;  %v281_v47 = vand.u32 4294901760, %v280_v45  ;;  %v288_v48 = vand.u32 4294901760, %v287_v46  ;;  %v314_v58 = vand.u32 4294901760, %v1356_v30  ;;  %v308_v61 = vsub.f32 %v1354_v29, %v307_v57 }
  0x42   : > { %1032 = vmatprep.subr.bf16.mxu0 %v1225_v1  ;;  %996 = vmatprep.subr.bf16.mxu1 %v1225_v1  ;;  %v295_v55 = vand.u32 4294901760, %v294_v53  ;;  %v302_v56 = vand.u32 4294901760, %v301_v54  ;;  %v1012_v3 = vpack.c.bf16 %v1338_v17, %v1336_v16  ;;  %v1015_v4 = vpack.c.bf16 %v1342_v22, %v1340_v21  ;;  %p1162_p4 = por %p1161_p3, %p1160_p2 }
  0x43   : > { %v1003_v51 = vpack.c.bf16 %v288_v48, %v281_v47  ;;  %v1045_v60 = vpack.c.bf16 %v314_v58, %v307_v57  ;;  %v315_v62 = vsub.f32 %v1356_v30, %v314_v58  ;;  %v309_v63 = vand.u32 4294901760, %v308_v61 }
  0x44   : > { %v1006_v59 = vpack.c.bf16 %v302_v56, %v295_v55  ;;  %v1018_v5 = vpack.c.bf16 %v1352_v28, %v1347_v25  ;;  %v1021_v6 = vpack.c.bf16 %v1356_v30, %v1354_v29  ;;  %v167_v7 = vlaneseq  ;;  %p1163_p7 = pnand %p1162_p4, %p1156_p12 }
  0x45   : > { %1034 = vmatpush3.bf16.msra.mxu0 %v1372_v38  ;;  %998 = vmatpush3.bf16.msra.mxu1 %v1372_v38  ;;  %v316_v0 = vand.u32 4294901760, %v315_v62  ;;  %vm175_vm3 = vcmask 523264  }
  0x46   : > { %1035 = vmatprep.subr.bf16.mxu0 %v1225_v1  ;;  %999 = vmatprep.subr.bf16.mxu1 %v1225_v1  ;;  %v168_v8 = vand.u32 127, %v167_v7 }
  0x47   : > { %v1009_v2 = vpack.c.bf16 %v316_v0, %v309_v63 }
  0xbe   : > { %v171_v9 = vpop.permute.xlu0 %170 }
  0xbf   : > { %vm172_vm4 = vcmp.eq.s32.totalorder %v168_v8, %v171_v9 }
  0xc0   : > { %v811_v10 = vsel %vm172_vm4, 1.0, %v1227_v33 }
  0xc1   : > { %v177_v11 = vsel %vm175_vm3, %v811_v10, 0 }
  0xc2   : > { %v253_v12 = vsub.f32 %v177_v11, %v177_v11 }
  0xc4   : > { %v254_v13 = vand.u32 4294901760, %v253_v12 }
  0xc6   : > { %947 = vmatmul.mubr.f32.vlgmr.msra.gmra.mrb[0].mxu0 %v254_v13  ;;  %v255_v14 = vsub.f32 %v253_v12, %v254_v13 }
  0xc7   : > { %1037 = vmatpush3.bf16.msra.mxu0 %v1036_v35  ;;  %965 = vmatprep.mubr.msk.f32.mxu0 %vm1226_vm2, %v1227_v33 }
  0xc8   : > { %1038 = vmatprep.subr.bf16.mxu0 %v1225_v1  ;;  %v256_v16 = vand.u32 4294901760, %v255_v14 }
  0xca   : > { %890 = vmatmul.mubr.f32.vlgmr.msra.gmra.mrb[0].mxu1 %v256_v16 }
  0xcb   : > { %1001 = vmatpush3.bf16.msra.mxu1 %v1000_v43  ;;  %1040 = vmatpush3.bf16.msra.mxu0 %v1039_v44 }
  0xcc   : > { %1002 = vmatprep.subr.bf16.mxu1 %v1225_v1  ;;  %1041 = vmatprep.subr.bf16.mxu0 %v1225_v1 }
  0xcd   : > { %908 = vmatprep.mubr.msk.f32.mxu1 %vm1226_vm2, %v1227_v33 }
  0xcf   : > { %1004 = vmatpush3.bf16.msra.mxu1 %v1003_v51  ;;  %1043 = vmatpush3.bf16.msra.mxu0 %v1042_v52 }
  0xd0   : > { %1005 = vmatprep.subr.bf16.mxu1 %v1225_v1  ;;  %1044 = vmatprep.subr.bf16.mxu0 %v1225_v1 }
  0xd3   : > { %1007 = vmatpush3.bf16.msra.mxu1 %v1006_v59  ;;  %1046 = vmatpush3.bf16.msra.mxu0 %v1045_v60 }
  0xd4   : > { %1008 = vmatprep.subr.bf16.mxu1 %v1225_v1  ;;  %1047 = vmatprep.subr.bf16.mxu0 %v1225_v1 }
  0xd6   : > { %966 = vmatmul.mubr.msk.f32.vlgmr.msra.gmra.mrb[0].mxu0 %vm175_vm3, %v811_v10 }
  0xd7   : > { %1010 = vmatpush3.bf16.msra.mxu1 %v1009_v2  ;;  %1049 = vmatpush3.bf16.msra.mxu0 %v1334_v15 }
  0xd8   : > { %1011 = vmatprep.subr.bf16.mxu1 %v1225_v1  ;;  %1050 = vmatprep.subr.bf16.mxu0 %v1225_v1 }
  0xd9   : > { %984 = vmatprep.mubr.msk.f32.mxu0 %vm1226_vm2, %v1227_v33 }
  0xda   : > { %909 = vmatmul.mubr.msk.f32.vlgmr.msra.gmra.mrb[0].mxu1 %vm175_vm3, %v811_v10 }
  0xdb   : > { %1013 = vmatpush3.bf16.msra.mxu1 %v1012_v3  ;;  %1052 = vmatpush3.bf16.msra.mxu0 %v1345_v23 }
  0xdc   : > { %1014 = vmatprep.subr.bf16.mxu1 %v1225_v1  ;;  %1053 = vmatprep.subr.bf16.mxu0 %v1225_v1 }
  0xdd   : > { %927 = vmatprep.mubr.msk.f32.mxu1 %vm1226_vm2, %v1227_v33 }
  0xdf   : > { %1016 = vmatpush3.bf16.msra.mxu1 %v1015_v4  ;;  %1055 = vmatpush3.bf16.msra.mxu0 %v1360_v32 }
  0xe0   : > { %1017 = vmatprep.subr.bf16.mxu1 %v1225_v1  ;;  %1056 = vmatprep.subr.bf16.mxu0 %v1225_v1 }
  0xe3   : > { %1019 = vmatpush3.bf16.msra.mxu1 %v1018_v5  ;;  %1058 = vmatpush3.bf16.msra.mxu0 %v1372_v38 }
  0xe4   : > { %1020 = vmatprep.subr.bf16.mxu1 %v1225_v1 }
  0xe6   : > { %985 = vmatmul.mubr.msk.f32.vlgmr.msra.gmra.mrb[0].mxu0 %vm175_vm3, %v811_v10 }
  0xe7   : > { %1022 = vmatpush3.bf16.msra.mxu1 %v1021_v6 }
  0xea   : > { %928 = vmatmul.mubr.f32.vlgmr.msra.gmra.mrb[0].mxu1 %v253_v12 }
 0x1b9   : > { %v712_v15 = vpop.f32.mrb[0].mxu0 }
 0x1ba   : > { %v986_v17 = vpop.f32.mrb[1].mxu0 }
 0x1bd   : > { %v457_v18 = vpop.f32.mrb[0].mxu1 }
 0x1be   : > { %v1059_v19 = vadd.f32 %v712_v15, %v457_v18  ;;  %v929_v20 = vpop.f32.mrb[1].mxu1 }
 0x1c0   : > { %v716_v21 = vmul.f32 11.313708, %v1059_v19 }
 0x1c2   : > { %717 = vst [vmem:[%s149_s26] sm:$0xff] %v716_v21 }
 0x1c3   : > { %1166 = shalt.err (!%p1163_p7)
}
 0x1c4   : > { %s1167_s7 = scalar_lea.hbm %s1438_s30, 128  ;;  %s1171_s16 = scalar_lea.hbm %s1482_s2, 256 }
 0x1c5   : > { %p1168_p8 = scmp.ne.s32.totalorder %s1438_s30, %s1167_s7  ;;  %p1172_p1 = scmp.lt.u32.totalorder %s1438_s30, %s1482_s2 }
 0x1c6   : > { %p1173_p0 = scmp.lt.u32.totalorder %s1171_s16, %s1167_s7  ;;  %p1175_p6 = scmp.lt.u32.totalorder %s1167_s7, %s1438_s30 }
 0x1c7   : > { %p1169_p11 = pnand %p1168_p8, %p1493_p9 }
 0x1c8   : > { %p1174_p5 = por %p1173_p0, %p1172_p1 }
 0x1c9   : > { %p1170_p13 = pneg %p1169_p11 }
 0x1ca   : > { %p1176_p10 = por %p1175_p6, %p1174_p5 }
 0x1cc   : > { %p1177_p12 = pnand %p1176_p10, %p1170_p13 }
 0x1ce   : > { %1180 = shalt.err (!%p1177_p12)
}
 0x1cf   : > { %1072 = dma.vmem_to_hbm [thread:$0]  (%p1493_p9), %s1440_s27, 128, %s1438_s30, %s719_s3  }
 0x1d0 PF: > { %p1084_p2 = scmp.ge.s32.totalorder %s1219_s12, 2  ;;  %s744_s22 = sand.u32 1, %s1207_s9  }
 0x1d1   : > { %p1494_p3 = scmp.ne.s32.totalorder %s1487_s20, 0  ;;  %s745_s23 = scalar_lea.sflag [#allocation4], %s744_s22 }
 0x1d3   : > { %p1079_p4 = pnand %p1084_p2, %p1494_p3 }
 0x1d5   : > { %1202 = dma.done.wait (!%p1079_p4), %s745_s23, 128  }
 0x1d6   : > { %1204 = vsyncadd (!%p1079_p4), %s745_s23, 4294967168  ;;  %p13_p7 = scmp.ge.s32.totalorder %s1269_s15, 4   ;;  %s1495_s9 = smov %s1211_s10 }
 0x1d7   : > { %s1496_s10 = smov %s1215_s11  ;;  %s1497_s11 = smov %s1280_s18 }
 0x1d8   : > { %s1498_s12 = smov %s1269_s15  ;;  %15 = sbr.rel (!%p13_p7) target bundleno = 4 (0x4), region = 68 }
 0x1df   :  { %750 = vsyncpa [#allocation3], 1 }
 0x1e0   :  { %752 = vsyncpa [#allocation3 + $0x1], 1 }
 0x1e1   :  { %753 = vsyncpa [#allocation4], 1 }
 0x1e2   :  { %755 = vsyncpa [#allocation4 + $0x1], 1 }

</bundles_post_ra>
